<compile_context>
chip_gen: v7x
topology: tpu7x:2x2x1
jax: 0.10.0
libtpu: 0.0.40
codegen_flags: <defaults>
</compile_context>

<pallas_src>
import functools

import jax
import jax.numpy as jnp
from jax.experimental import pallas as pl
from jax.experimental.pallas import tpu as pltpu

LANE = 128
SUBLANE = 8


def _round_up(n, m):
    return ((n + m - 1) // m) * m


def mlp_kernel(x_ref, w1_ref, b1_ref, w2_ref, b2_ref, w3_ref, b3_ref, o_ref):
    # bf16 operands into the MXU, f32 accumulation, f32 elementwise epilogues.
    x = x_ref[...].astype(jnp.bfloat16)
    h = jnp.dot(x, w1_ref[...], preferred_element_type=jnp.float32)
    h = jnp.maximum(h + b1_ref[...], 0.0)
    h = jnp.dot(h.astype(jnp.bfloat16), w2_ref[...],
                preferred_element_type=jnp.float32)
    h = jnp.maximum(h + b2_ref[...], 0.0)
    h = jnp.dot(h.astype(jnp.bfloat16), w3_ref[...],
                preferred_element_type=jnp.float32)
    o_ref[...] = (h + b3_ref[...]).astype(o_ref.dtype)


def init_mlp_params(key, in_features, out_features, hidden_dim=50):
    """nn.Linear-style uniform init.

    Weights stored as (in_dim, out_dim) in bf16; the hidden dim is zero-padded
    to 128 lanes (mathematically inert: padded units see 0 weights and 0 bias,
    ReLU(0)=0).  The output dim and in_features are NOT padded.  Biases stay
    f32 (bias-add runs in f32 on the VPU).
    """
    hid_p = _round_up(hidden_dim, LANE)  # 50 -> 128; do NOT pad beyond 128.

    def linear_init(k, fan_in, fan_out, pad_in, pad_out):
        kw, kb = jax.random.split(k)
        bound = 1.0 / jnp.sqrt(float(fan_in))
        w = jax.random.uniform(kw, (fan_in, fan_out), jnp.float32, -bound, bound)
        b = jax.random.uniform(kb, (fan_out,), jnp.float32, -bound, bound)
        w_pad = jnp.zeros((pad_in, pad_out), jnp.float32).at[:fan_in, :fan_out].set(w)
        b_pad = jnp.zeros((1, pad_out), jnp.float32).at[0, :fan_out].set(b)
        return w_pad.astype(jnp.bfloat16), b_pad

    k1, k2, k3 = jax.random.split(key, 3)
    w1, b1 = linear_init(k1, in_features, hidden_dim, in_features, hid_p)
    w2, b2 = linear_init(k2, hidden_dim, hidden_dim, hid_p, hid_p)
    w3, b3 = linear_init(k3, hidden_dim, out_features, hid_p, out_features)
    return (w1, b1, w2, b2, w3, b3)


@functools.partial(jax.jit, static_argnames=("block_batch",))
def mlp_param_forward(x, params, block_batch=2048):
    """Fused MLP forward.  x: (B, in_features) float32 -> (B, out_features) f32."""
    w1, b1, w2, b2, w3, b3 = params
    batch, in_f = x.shape
    hid_p = w1.shape[1]
    out_f = w3.shape[1]

    # Batch tile: multiple of 8 sublanes; force >=2 grid steps when the batch
    # allows it so the "parallel" axis actually spans both v7x TensorCores.
    b8 = _round_up(batch, SUBLANE)
    tb = min(block_batch, b8)
    if b8 >= 2 * SUBLANE:
        tb = min(tb, _round_up(pl.cdiv(b8, 2), SUBLANE))
    grid = (pl.cdiv(batch, tb),)  # edge block clipped by Pallas; no jnp.pad of x

    # VMEM budget from actual tile bytes + headroom, capped generation-aware.
    weight_bytes = 2 * (w1.size + w2.size + w3.size) + 4 * (b1.size + b2.size + b3.size)
    stream_bytes = 2 * (tb * in_f * 4 + tb * out_f * 4)  # double-buffered x / out
    interm_bytes = 4 * 2 * tb * hid_p                     # fused h intermediates
    vmem_limit = 2 * weight_bytes + stream_bytes + interm_bytes + (8 << 20)
    try:
        vmem_cap = pltpu.get_tpu_info().vmem_capacity_bytes
    except Exception:
        vmem_cap = 64 << 20  # conservative (v7x) fallback
    vmem_limit = int(min(max(vmem_limit, 16 << 20), 0.65 * vmem_cap))

    cost = pl.CostEstimate(
        flops=2 * batch * (in_f * hid_p + hid_p * hid_p + hid_p * out_f),
        transcendentals=0,
        bytes_accessed=4 * batch * (in_f + out_f) + weight_bytes,
    )

    resident = lambda i: (0, 0)  # weights/biases: same block every grid step
    out = pl.pallas_call(
        mlp_kernel,
        out_shape=jax.ShapeDtypeStruct((batch, out_f), jnp.float32),
        grid=grid,
        in_specs=[
            pl.BlockSpec((tb, in_f), lambda i: (i, 0)),  # streamed activations
            pl.BlockSpec(w1.shape, resident),
            pl.BlockSpec(b1.shape, resident),
            pl.BlockSpec(w2.shape, resident),
            pl.BlockSpec(b2.shape, resident),
            pl.BlockSpec(w3.shape, resident),
            pl.BlockSpec(b3.shape, resident),
        ],
        out_specs=pl.BlockSpec((tb, out_f), lambda i: (i, 0)),
        compiler_params=pltpu.CompilerParams(
            dimension_semantics=("parallel",),
            vmem_limit_bytes=vmem_limit,
        ),
        cost_estimate=cost,
    )(x, w1, b1, w2, b2, w3, b3)
    return out


def mlp_reference(x, params):
    """Pure-JAX reference emulating the kernel's bf16 casts (weights already bf16)."""
    w1, b1, w2, b2, w3, b3 = params
    f32 = jnp.float32
    h = x.astype(jnp.bfloat16).astype(f32) @ w1.astype(f32) + b1[0]
    h = jnp.maximum(h, 0.0)
    h = h.astype(jnp.bfloat16).astype(f32) @ w2.astype(f32) + b2[0]
    h = jnp.maximum(h, 0.0)
    h = h.astype(jnp.bfloat16).astype(f32) @ w3.astype(f32) + b3[0]
    return h


if __name__ == "__main__":
    in_features, out_features, hidden_dim = 16, 10, 50

    key = jax.random.PRNGKey(0)
    kx1, kx2, kp = jax.random.split(key, 3)
    params = init_mlp_params(kp, in_features, out_features, hidden_dim)

    # Small batch (single grid step).
    x_small = jax.random.normal(kx1, (8, in_features), jnp.float32)
    out_small = jax.block_until_ready(mlp_param_forward(x_small, params))
    ref_small = mlp_reference(x_small, params)
    assert out_small.shape == (8, out_features)
    assert jnp.allclose(out_small, ref_small, atol=5e-3, rtol=5e-3)

    # Ragged batch: 3 grid steps of 128 with a clipped edge block (no jnp.pad).
    x_big = jax.random.normal(kx2, (300, in_features), jnp.float32)
    out_big = jax.block_until_ready(
        mlp_param_forward(x_big, params, block_batch=128))
    ref_big = mlp_reference(x_big, params)
    assert out_big.shape == (300, out_features)
    assert jnp.allclose(out_big, ref_big, atol=5e-3, rtol=5e-3)

    print("KERNEL_OK")
</pallas_src>

<mosaic_0001>
module attributes {stable_mosaic.version = 11 : i64} {
  func.func @mlp_kernel(%arg0: i32, %arg1: memref<8x16xf32, #tpu.memory_space<vmem>>, %arg2: memref<16x128xbf16, #tpu.memory_space<vmem>>, %arg3: memref<1x128xf32, #tpu.memory_space<vmem>>, %arg4: memref<128x128xbf16, #tpu.memory_space<vmem>>, %arg5: memref<1x128xf32, #tpu.memory_space<vmem>>, %arg6: memref<128x10xbf16, #tpu.memory_space<vmem>>, %arg7: memref<1x10xf32, #tpu.memory_space<vmem>>, %arg8: memref<8x10xf32, #tpu.memory_space<vmem>>) attributes {dimension_semantics = [#tpu.dimension_semantics<parallel>], iteration_bounds = array<i64: 1>, scalar_prefetch = 0 : i64, scratch_operands = 0 : i64, tpu.core_type = #tpu.core_type<tc>, window_params = [{transform_indices = @transform_0, window_bounds = array<i64: 8, 16>}, {pipeline_mode = #tpu.pipeline_mode<synchronous>, transform_indices = @transform_1, window_bounds = array<i64: 16, 128>}, {pipeline_mode = #tpu.pipeline_mode<synchronous>, transform_indices = @transform_2, window_bounds = array<i64: 1, 128>}, {pipeline_mode = #tpu.pipeline_mode<synchronous>, transform_indices = @transform_3, window_bounds = array<i64: 128, 128>}, {pipeline_mode = #tpu.pipeline_mode<synchronous>, transform_indices = @transform_4, window_bounds = array<i64: 1, 128>}, {pipeline_mode = #tpu.pipeline_mode<synchronous>, transform_indices = @transform_5, window_bounds = array<i64: 128, 10>}, {pipeline_mode = #tpu.pipeline_mode<synchronous>, transform_indices = @transform_6, window_bounds = array<i64: 1, 10>}, {transform_indices = @transform_7, window_bounds = array<i64: 8, 10>}]} {
    %c0 = arith.constant 0 : index
    %c0_0 = arith.constant 0 : index
    %0 = vector.load %arg1[%c0, %c0_0] : memref<8x16xf32, #tpu.memory_space<vmem>>, vector<8x16xf32>
    %1 = arith.truncf %0 : vector<8x16xf32> to vector<8x16xbf16>
    %c0_1 = arith.constant 0 : index
    %c0_2 = arith.constant 0 : index
    %2 = vector.load %arg2[%c0_1, %c0_2] : memref<16x128xbf16, #tpu.memory_space<vmem>>, vector<16x128xbf16>
    %cst = arith.constant dense<0.000000e+00> : vector<8x128xf32>
    %3 = tpu.matmul %1, %2, %cst {dimension_numbers = #tpu.dot_dimension_numbers<[1], [0], [0], [1], [0, 0, 1, 1], [], []>} : vector<8x16xbf16>, vector<16x128xbf16>, vector<8x128xf32> -> vector<8x128xf32>
    %c0_3 = arith.constant 0 : index
    %c0_4 = arith.constant 0 : index
    %4 = vector.load %arg3[%c0_3, %c0_4] : memref<1x128xf32, #tpu.memory_space<vmem>>, vector<1x128xf32>
    %5 = vector.broadcast %4 : vector<1x128xf32> to vector<8x128xf32>
    %6 = arith.addf %3, %5 : vector<8x128xf32>
    %cst_5 = arith.constant 0.000000e+00 : f32
    %7 = vector.broadcast %cst_5 : f32 to vector<8x128xf32>
    %8 = arith.maximumf %6, %7 : vector<8x128xf32>
    %9 = arith.truncf %8 : vector<8x128xf32> to vector<8x128xbf16>
    %c0_6 = arith.constant 0 : index
    %c0_7 = arith.constant 0 : index
    %10 = vector.load %arg4[%c0_6, %c0_7] : memref<128x128xbf16, #tpu.memory_space<vmem>>, vector<128x128xbf16>
    %cst_8 = arith.constant dense<0.000000e+00> : vector<8x128xf32>
    %11 = tpu.matmul %9, %10, %cst_8 {dimension_numbers = #tpu.dot_dimension_numbers<[1], [0], [0], [1], [0, 0, 1, 1], [], []>} : vector<8x128xbf16>, vector<128x128xbf16>, vector<8x128xf32> -> vector<8x128xf32>
    %c0_9 = arith.constant 0 : index
    %c0_10 = arith.constant 0 : index
    %12 = vector.load %arg5[%c0_9, %c0_10] : memref<1x128xf32, #tpu.memory_space<vmem>>, vector<1x128xf32>
    %13 = vector.broadcast %12 : vector<1x128xf32> to vector<8x128xf32>
    %14 = arith.addf %11, %13 : vector<8x128xf32>
    %cst_11 = arith.constant 0.000000e+00 : f32
    %15 = vector.broadcast %cst_11 : f32 to vector<8x128xf32>
    %16 = arith.maximumf %14, %15 : vector<8x128xf32>
    %17 = arith.truncf %16 : vector<8x128xf32> to vector<8x128xbf16>
    %c0_12 = arith.constant 0 : index
    %c0_13 = arith.constant 0 : index
    %18 = vector.load %arg6[%c0_12, %c0_13] : memref<128x10xbf16, #tpu.memory_space<vmem>>, vector<128x10xbf16>
    %cst_14 = arith.constant dense<0.000000e+00> : vector<8x10xf32>
    %19 = tpu.matmul %17, %18, %cst_14 {dimension_numbers = #tpu.dot_dimension_numbers<[1], [0], [0], [1], [0, 0, 1, 1], [], []>} : vector<8x128xbf16>, vector<128x10xbf16>, vector<8x10xf32> -> vector<8x10xf32>
    %c0_15 = arith.constant 0 : index
    %c0_16 = arith.constant 0 : index
    %20 = vector.load %arg7[%c0_15, %c0_16] : memref<1x10xf32, #tpu.memory_space<vmem>>, vector<1x10xf32>
    %21 = vector.broadcast %20 : vector<1x10xf32> to vector<8x10xf32>
    %22 = arith.addf %19, %21 : vector<8x10xf32>
    %c0_17 = arith.constant 0 : index
    %c0_18 = arith.constant 0 : index
    %23 = vector.load %arg8[%c0_17, %c0_18] : memref<8x10xf32, #tpu.memory_space<vmem>>, vector<8x10xf32>
    tpu.vector_store %arg8[%c0_17, %c0_18], %22 {strides = array<i32>} : memref<8x10xf32, #tpu.memory_space<vmem>>, vector<8x10xf32>,
    return
  }
  func.func @transform_0(%arg0: i32) -> (i32, i32) {
    %c0_i32 = arith.constant 0 : i32
    %c0_i32_0 = arith.constant 0 : i32
    return %arg0, %c0_i32 : i32, i32
  }
  func.func @transform_1(%arg0: i32) -> (i32, i32) {
    %c0_i32 = arith.constant 0 : i32
    %c0_i32_0 = arith.constant 0 : i32
    %c0_i32_1 = arith.constant 0 : i32
    return %c0_i32, %c0_i32_0 : i32, i32
  }
  func.func @transform_2(%arg0: i32) -> (i32, i32) {
    %c0_i32 = arith.constant 0 : i32
    %c0_i32_0 = arith.constant 0 : i32
    %c0_i32_1 = arith.constant 0 : i32
    return %c0_i32, %c0_i32_0 : i32, i32
  }
  func.func @transform_3(%arg0: i32) -> (i32, i32) {
    %c0_i32 = arith.constant 0 : i32
    %c0_i32_0 = arith.constant 0 : i32
    %c0_i32_1 = arith.constant 0 : i32
    return %c0_i32, %c0_i32_0 : i32, i32
  }
  func.func @transform_4(%arg0: i32) -> (i32, i32) {
    %c0_i32 = arith.constant 0 : i32
    %c0_i32_0 = arith.constant 0 : i32
    %c0_i32_1 = arith.constant 0 : i32
    return %c0_i32, %c0_i32_0 : i32, i32
  }
  func.func @transform_5(%arg0: i32) -> (i32, i32) {
    %c0_i32 = arith.constant 0 : i32
    %c0_i32_0 = arith.constant 0 : i32
    %c0_i32_1 = arith.constant 0 : i32
    return %c0_i32, %c0_i32_0 : i32, i32
  }
  func.func @transform_6(%arg0: i32) -> (i32, i32) {
    %c0_i32 = arith.constant 0 : i32
    %c0_i32_0 = arith.constant 0 : i32
    %c0_i32_1 = arith.constant 0 : i32
    return %c0_i32, %c0_i32_0 : i32, i32
  }
  func.func @transform_7(%arg0: i32) -> (i32, i32) {
    %c0_i32 = arith.constant 0 : i32
    %c0_i32_0 = arith.constant 0 : i32
    return %arg0, %c0_i32 : i32, i32
  }
}

</mosaic_0001>

<bundles_post_ra>
// kernel: mlp_param_forward.1
= control target key start
LH: loop header
LB: loop body
LE: loop exit
PB: predicated region body
PF: predicated region fallthrough
CT: control target
= control target key end

     0   :  { %12 = vsyncpa [#allocation3], 0  ;;  %s654_s0 = inlined_call_operand.vmem [shape: f32[8,16], index: 0, kind: input, shape index: {}]   ;;  %s655_s1 = inlined_call_operand.hbm [shape: bf16[16,128], index: 1, kind: input, shape index: {}]   ;;  %s656_s2 = inlined_call_operand.vmem [shape: f32[1,128], index: 2, kind: input, shape index: {}]   ;;  %s657_s3 = inlined_call_operand.vmem [shape: bf16[128,128], index: 3, kind: input, shape index: {}]   ;;  %s658_s4 = inlined_call_operand.vmem [shape: f32[1,128], index: 4, kind: input, shape index: {}]   ;;  %s659_s5 = inlined_call_operand.vmem [shape: bf16[128,10], index: 5, kind: input, shape index: {}]   ;;  %s660_s6 = inlined_call_operand.vmem [shape: f32[1,10], index: 6, kind: input, shape index: {}]   ;;  %s661_s7 = inlined_call_operand.hbm [shape: f32[8,10], index: 7, kind: output, shape index: {}]  }
   0x1   :  { %13 = vsyncpa [#allocation4], 0  ;;  %s504_s24 = smov [#allocation2]   ;;  %s456_s28 = scalar_lea.hbm %s655_s1, 128 }
   0x2   :  { %s21_s25 = sshll.u32 %s504_s24, 4  ;;  %p457_p0 = scmp.ne.s32.totalorder %s655_s1, %s456_s28  ;;  %s22_s25 = int_to_ptr.vmem [resolvable:$true] %s21_s25 }
   0x3   :  { %p460_p1 = scmp.lt.u32.totalorder %s456_s28, %s655_s1 }
   0x5   :  { %p462_p2 = pnand %p460_p1, %p457_p0 }
   0x7   :  { %465 = shalt.err (!%p462_p2)
}
   0x8   :  { %s466_s10 = scalar_lea.vmem %s22_s25, 128  ;;  %p471_p4 = scmp.lt.s32.totalorder %s22_s25, %s22_s25 }
   0x9   :  { %p467_p3 = scmp.ne.s32.totalorder %s22_s25, %s466_s10  ;;  %p472_p5 = scmp.lt.s32.totalorder %s466_s10, %s466_s10 }
   0xb   :  { %p473_p6 = por %p472_p5, %p471_p4 }
   0xd   :  { %p474_p7 = pnand %p473_p6, %p467_p3 }
   0xf   :  { %477 = shalt.err (!%p474_p7)
}
  0x10   :  { %s505_s11 = smov 64   ;;  %s506_s12 = smov 4  }
  0x11   :  { %27 = dma.hbm_to_vmem [thread:$0]  %s655_s1, 128, %s22_s25, [#allocation3], %s505_s11, %s505_s11, %s506_s12  }
  0x12   :  { %500 = dma.done.wait [#allocation3], 128  }
  0x13   :  { %501 = vsyncadd [#allocation3], 4294967168  ;;  %v507_v0 = vmov 0.0   ;;  %vm508_vm0 = vmmov 0   ;;  %v439_v1 = vld [vmem:[#allocation2] sm:$0xff]   ;;  %vm59_vm1 = vcmask 130048  }
  0x14   :  { %387 = vmatprep.subr.bf16.mxu0 %v507_v0  ;;  %389 = vmatprep.mubr.msk.bf16.mxu0 %vm508_vm0, %v507_v0  ;;  %v42_v2 = vld [vmem:[%s654_s0] sm:$0xff]  ;;  %v441_v5 = vld [vmem:[%s657_s3 + $0x8] sm:$0xff]   ;;  %v442_v6 = vld [vmem:[%s657_s3 + $0x10] sm:$0xff]   ;;  %s509_s26 = smov [#allocation5]   ;;  %vm329_vm2 = vcmask 80896  }
  0x15   :  { %393 = vmatprep.subr.bf16.mxu1 %v507_v0  ;;  %409 = vmatprep.mubr.msk.bf16.mxu1 %vm508_vm0, %v507_v0  ;;  %v43_v3 = vpack.c.bf16 %v42_v2, %v42_v2  ;;  %v440_v4 = vld [vmem:[%s657_s3] sm:$0xff]   ;;  %v443_v7 = vld [vmem:[%s657_s3 + $0x18] sm:$0xff]   ;;  %v445_v9 = vld [vmem:[%s657_s3 + $0x28] sm:$0xff]   ;;  %s337_s27 = sshll.u32 %s509_s26, 4  ;;  %s338_s27 = int_to_ptr.vmem [resolvable:$true] %s337_s27 }
  0x16   :  { %388 = vmatpush3.bf16.msra.mxu0 %v439_v1  ;;  %394 = vmatpush3.bf16.msra.mxu1 %v440_v4  ;;  %v444_v8 = vld [vmem:[%s657_s3 + $0x20] sm:$0xff]   ;;  %v446_v10 = vld [vmem:[%s657_s3 + $0x30] sm:$0xff]   ;;  %v447_v11 = vld [vmem:[%s657_s3 + $0x38] sm:$0xff]   ;;  %p483_p9 = scmp.lt.s32.totalorder %s338_s27, %s338_s27 }
  0x17   :  { %413 = vmatprep.subr.bf16.mxu0 %v507_v0  ;;  %395 = vmatprep.subr.bf16.mxu1 %v507_v0  ;;  %v448_v12 = vld [vmem:[%s659_s5] sm:$0xff]   ;;  %v449_v13 = vld [vmem:[%s659_s5 + $0x8] sm:$0xff]   ;;  %v450_v14 = vld [vmem:[%s659_s5 + $0x10] sm:$0xff]  }
  0x18   :  { %v451_v15 = vld [vmem:[%s659_s5 + $0x18] sm:$0xff]   ;;  %v452_v16 = vld [vmem:[%s659_s5 + $0x20] sm:$0xff]   ;;  %v453_v17 = vld [vmem:[%s659_s5 + $0x28] sm:$0xff]  }
  0x19   :  { %390 = vmatmul.mubr.msk.bf16.vlgmr.msra.gmra.mrb[0].mxu0 %vm59_vm1, %v43_v3  ;;  %v346_v18 = vld [vmem:[%s656_s2] ss:$0 sm:$0xff]  ;;  %v454_v26 = vld [vmem:[%s659_s5 + $0x30] sm:$0xff]   ;;  %v455_v27 = vld [vmem:[%s659_s5 + $0x38] sm:$0xff]  }
  0x1a   :  { %429 = vmatprep.mubr.msk.bf16.mxu0 %vm508_vm0, %v507_v0  ;;  %396 = vmatpush3.bf16.msra.mxu1 %v441_v5  ;;  %v349_v28 = vld [vmem:[%s658_s4] ss:$0 sm:$0xff]  ;;  %s478_s4 = scalar_lea.vmem %s338_s27, 128 }
  0x1b   :  { %397 = vmatprep.subr.bf16.mxu1 %v507_v0  ;;  %414 = vmatpush3.bf16.msra.mxu0 %v448_v12  ;;  %v358_v36 = vld [vmem:[%s660_s6] ss:$0 sm:$0xff]  ;;  %p479_p8 = scmp.ne.s32.totalorder %s338_s27, %s478_s4  ;;  %p484_p10 = scmp.lt.s32.totalorder %s478_s4, %s478_s4 }
  0x1c   :  { %415 = vmatprep.subr.bf16.mxu0 %v507_v0 }
  0x1d   :  { %p485_p11 = por %p484_p10, %p483_p9 }
  0x1e   :  { %398 = vmatpush3.bf16.msra.mxu1 %v442_v6 }
  0x1f   :  { %399 = vmatprep.subr.bf16.mxu1 %v507_v0  ;;  %416 = vmatpush3.bf16.msra.mxu0 %v449_v13  ;;  %p486_p12 = pnand %p485_p11, %p479_p8 }
  0x20   :  { %417 = vmatprep.subr.bf16.mxu0 %v507_v0 }
  0x22   :  { %400 = vmatpush3.bf16.msra.mxu1 %v443_v7 }
  0x23   :  { %401 = vmatprep.subr.bf16.mxu1 %v507_v0  ;;  %418 = vmatpush3.bf16.msra.mxu0 %v450_v14 }
  0x24   :  { %419 = vmatprep.subr.bf16.mxu0 %v507_v0 }
  0x26   :  { %402 = vmatpush3.bf16.msra.mxu1 %v444_v8 }
  0x27   :  { %403 = vmatprep.subr.bf16.mxu1 %v507_v0  ;;  %420 = vmatpush3.bf16.msra.mxu0 %v451_v15 }
  0x28   :  { %421 = vmatprep.subr.bf16.mxu0 %v507_v0 }
  0x2a   :  { %404 = vmatpush3.bf16.msra.mxu1 %v445_v9 }
  0x2b   :  { %405 = vmatprep.subr.bf16.mxu1 %v507_v0  ;;  %422 = vmatpush3.bf16.msra.mxu0 %v452_v16 }
  0x2c   :  { %423 = vmatprep.subr.bf16.mxu0 %v507_v0 }
  0x2e   :  { %406 = vmatpush3.bf16.msra.mxu1 %v446_v10 }
  0x2f   :  { %407 = vmatprep.subr.bf16.mxu1 %v507_v0  ;;  %424 = vmatpush3.bf16.msra.mxu0 %v453_v17 }
  0x30   :  { %425 = vmatprep.subr.bf16.mxu0 %v507_v0 }
  0x32   :  { %408 = vmatpush3.bf16.msra.mxu1 %v447_v11 }
  0x33   :  { %426 = vmatpush3.bf16.msra.mxu0 %v454_v26 }
  0x34   :  { %427 = vmatprep.subr.bf16.mxu0 %v507_v0 }
  0x37   :  { %428 = vmatpush3.bf16.msra.mxu0 %v455_v27 }
  0xec   :  { %v97_v19 = vpop.f32.mrb[0].mxu0 }
  0xed   :  { %v98_v20 = vadd.f32 %v346_v18, %v97_v19  ;;  %v391_v21 = vpop.f32.mrb[1].mxu0 }
  0xee   :  { %v100_v22 = vpop.f32.mrb[2].mxu0 }
  0xef   :  { %v103_v23 = vmax.f32 %v98_v20, 0.0  ;;  %v392_v24 = vpop.f32.mrb[3].mxu0 }
  0xf1   :  { %v104_v25 = vpack.c.bf16 %v103_v23, %v103_v23 }
  0xf3   :  { %410 = vmatmul.mubr.bf16.vlgmr.msra.gmra.mrb[0].mxu1 %v104_v25 }
 0x1c6   :  { %v210_v29 = vpop.f32.mrb[0].mxu1 }
 0x1c7   :  { %v211_v30 = vadd.f32 %v349_v28, %v210_v29  ;;  %v411_v31 = vpop.f32.mrb[1].mxu1 }
 0x1c8   :  { %v213_v32 = vpop.f32.mrb[2].mxu1 }
 0x1c9   :  { %v216_v33 = vmax.f32 %v211_v30, 0.0  ;;  %v412_v34 = vpop.f32.mrb[3].mxu1 }
 0x1cb   :  { %v217_v35 = vpack.c.bf16 %v216_v33, %v216_v33 }
 0x1cd   :  { %430 = vmatmul.mubr.bf16.vlgmr.msra.gmra.mrb[4].mxu0 %v217_v35 }
 0x2a0   :  { %v323_v37 = vpop.f32.mrb[4].mxu0 }
 0x2a1   :  { %v324_v38 = vadd.f32 %v358_v36, %v323_v37  ;;  %v431_v39 = vpop.f32.mrb[5].mxu0 }
 0x2a2   :  { %v326_v40 = vpop.f32.mrb[6].mxu0 }
 0x2a3   :  { %v432_v41 = vpop.f32.mrb[7].mxu0  ;;  %330 = vst.msk [vmem:[#allocation5] sm:$0xff] %vm329_vm2, %v324_v38 }
 0x2a4   :  { %489 = shalt.err (!%p486_p12)
}
 0x2a5   :  { %s490_s6 = scalar_lea.hbm %s661_s7, 128 }
 0x2a6   :  { %p491_p13 = scmp.ne.s32.totalorder %s661_s7, %s490_s6  ;;  %p494_p0 = scmp.lt.u32.totalorder %s490_s6, %s661_s7 }
 0x2a8   :  { %p496_p1 = pnand %p494_p0, %p491_p13 }
 0x2aa   :  { %499 = shalt.err (!%p496_p1)
}
 0x2ab   :  { %340 = dma.vmem_to_hbm [thread:$0]  %s338_s27, 128, %s661_s7, [#allocation4]  }
 0x2ac   :  { %502 = dma.done.wait [#allocation4], 128  }
 0x2ad   :  { %503 = vsyncadd [#allocation4], 4294967168 }
 0x2ae   :  { %344 = vsyncpa [#allocation3], 1 }
 0x2af   :  { %345 = vsyncpa [#allocation4], 1 }

</bundles_post_ra>
